<compile_context>
chip_gen: v7x
topology: tpu7x:2x2x1
jax: 0.10.0
libtpu: 0.0.40
codegen_flags: <defaults>
</compile_context>

<pallas_src>
import functools

import jax
import jax.numpy as jnp
from jax import lax
from jax.experimental import pallas as pl
from jax.experimental.pallas import tpu as pltpu

_MiB = 1024 * 1024


def _round_up(x, m):
    return (x + m - 1) // m * m


def _vmem_limit_and_budget():
    """Generation-aware VMEM sizing (128 MiB on v5e/v6e, 64 MiB on v7x)."""
    cap = 64 * _MiB
    try:
        info = pltpu.get_tpu_info()
        cap = int(getattr(info, "vmem_capacity_bytes", cap)) or cap
    except Exception:
        pass
    cap = min(max(cap, 48 * _MiB), 256 * _MiB)
    limit = max(cap - 16 * _MiB, 32 * _MiB)   # headroom for compiler-internal scratch
    budget = int(limit * 0.85)                # headroom for pipeline bookkeeping
    return limit, budget


def _choose_tk(n, l, budget):
    """Largest reduction tile (multiple of 128) fitting the VMEM budget, capped
    so the reduction grid keeps enough steps for DMA/compute overlap."""
    n8 = _round_up(n, 8)        # sublane padding the compiler applies internally
    n128 = _round_up(n, 128)    # lane padding of the resident gram block
    gram_bytes = 2 * n8 * n128 * 4        # resident partial-gram output block (2x headroom)
    min_feat_bytes = 2 * n8 * 128 * 4     # minimal double-buffered feature block
    if gram_bytes + min_feat_bytes > budget:
        raise ValueError(
            f"StyleLoss Pallas kernel: B*C={n} is too large for a VMEM-resident "
            f"gram accumulator ({gram_bytes + min_feat_bytes} B needed, budget "
            f"{budget} B). "
            "TODO(synk): tile the (N,N) gram over (i,j) grid axes for this case.")
    avail = budget - gram_bytes
    tk_budget = max(128, (avail // (2 * n8 * 4)) // 128 * 128)
    # Keep >= ~8 reduction steps total so DMA and MXU work overlap, but never
    # below 512 lanes per step (amortizes the ~0.35 us/step grid overhead).
    tk_overlap = max(512, _round_up(pl.cdiv(l, 8), 128))
    tk = min(tk_budget, tk_overlap, _round_up(l, 128))
    return max(tk, 128)


def _prepare_features(x_nchw):
    """NCHW -> (N, L) feature matrix. Contiguous reshape only: no padding and
    no extra HBM round-trip of the feature matrix."""
    b, c, h, w = x_nchw.shape
    n = b * c
    l = h * w
    feats = x_nchw.reshape(n, l)
    if feats.dtype != jnp.bfloat16:
        feats = feats.astype(jnp.float32)   # no-op for float32 inputs
    return feats, n, l


# ---------------------------------------------------------------------------
# Partial-gram kernel: each "split" of the reduction accumulates F_blk @ F_blk^T
# into its own VMEM-resident (N, N) output block.
# ---------------------------------------------------------------------------
def _gram_partial_kernel(f_ref, out_ref, *, l, tk, nk_half, compute_dtype):
    c = pl.program_id(0)
    k = pl.program_id(1)

    @pl.when(k == 0)
    def _():
        out_ref[...] = jnp.zeros_like(out_ref)

    fk = f_ref[...]                                   # (N, tk) feature block
    if compute_dtype is not None and fk.dtype != compute_dtype:
        fk = fk.astype(compute_dtype)

    # Zero columns past the true feature length L.  Covers (a) the ragged tail
    # of the last real block and (b) the clamped duplicate block the second
    # grid half sees when the number of k-blocks is odd (rem <= 0 there).
    k_global = c * nk_half + k
    rem = l - k_global * tk
    col = lax.broadcasted_iota(jnp.int32, fk.shape, 1)
    fk = jnp.where(col < rem, fk, jnp.zeros_like(fk))

    # F_blk @ F_blk^T, contracting the last dim of both operands.  Features
    # stay in their natural (N, L) layout (free reshape from NCHW); any
    # per-block operand flip rides the XLU slot instead of an extra HBM pass.
    out_ref[...] += lax.dot_general(
        fk, fk,
        dimension_numbers=(((1,), (1,)), ((), ())),
        preferred_element_type=jnp.float32,
    )


def _gram_partials(feats, n, l, *, compute_in_bf16):
    vmem_limit, vmem_budget = _vmem_limit_and_budget()
    tk = _choose_tk(n, l, vmem_budget)
    nk = pl.cdiv(l, tk)
    splits = min(2, nk)            # 2-way "parallel" split -> both v7x TensorCores
    nk_half = pl.cdiv(nk, splits)

    def f_index_map(c, k):
        # Clamp so the DMA block start never goes past the array; the kernel
        # masks the duplicate block's contribution to zero.
        return (0, jnp.minimum(c * nk_half + k, nk - 1))

    kernel = functools.partial(
        _gram_partial_kernel,
        l=l, tk=tk, nk_half=nk_half,
        compute_dtype=jnp.bfloat16 if compute_in_bf16 else None,
    )
    return pl.pallas_call(
        kernel,
        out_shape=jax.ShapeDtypeStruct((splits, n, n), jnp.float32),
        grid_spec=pltpu.PrefetchScalarGridSpec(
            num_scalar_prefetch=0,
            grid=(splits, nk_half),
            in_specs=[pl.BlockSpec((n, tk), f_index_map)],
            out_specs=pl.BlockSpec((None, n, n), lambda c, k: (c, 0, 0)),
        ),
        compiler_params=pltpu.CompilerParams(
            dimension_semantics=("parallel", "arbitrary"),
            vmem_limit_bytes=vmem_limit,
        ),
    )(feats)


def gram_matrix_pallas(x_nchw, *, compute_in_bf16=False):
    """x_nchw: (B, C, H, W) -> gram (B*C, B*C) float32 = F @ F^T / (B*C*H*W)."""
    feats, n, l = _prepare_features(x_nchw)
    parts = _gram_partials(feats, n, l, compute_in_bf16=compute_in_bf16)
    return jnp.sum(parts, axis=0) * (1.0 / float(n * l))


def style_loss_pallas(x_nchw, target_gram, *, compute_in_bf16=False):
    """mse(gram(x), target_gram).  The heavy F@F^T runs in the Pallas kernel;
    the N^2-element partial combine + MSE is trivial and stays in plain JAX
    (so no target gram / diff temporary ever occupies VMEM)."""
    gram = gram_matrix_pallas(x_nchw, compute_in_bf16=compute_in_bf16)
    return jnp.mean(jnp.square(gram - target_gram))


# ---------------------------------------------------------------------------
# StyleLoss module equivalent
# ---------------------------------------------------------------------------
class StyleLoss:
    def __init__(self, target_nchw, *, compute_in_bf16=False):
        self._compute_in_bf16 = compute_in_bf16
        # detached constant, like PyTorch's self.target
        self.target = gram_matrix_pallas(target_nchw, compute_in_bf16=compute_in_bf16)
        self.loss = None

    def __call__(self, style_input_nchw):
        self.loss = style_loss_pallas(style_input_nchw, self.target,
                                      compute_in_bf16=self._compute_in_bf16)
        return style_input_nchw     # passthrough, like the PyTorch module

    forward = __call__

    # TODO(synk): callback() / loss.backward(retain_graph=True) has no Pallas
    # equivalent here; gradients would come from jax.grad over these wrappers.


# TODO(synk): for very large B*C (gram no longer VMEM-resident), tile the
# (N,N) gram over (i,j) grid axes and exploit symmetry (compute i<=j only).


if __name__ == "__main__":
    key = jax.random.PRNGKey(0)
    k_t, k_x = jax.random.split(key)

    B, C, H, W = 2, 4, 16, 16
    target = jax.random.normal(k_t, (B, C, H, W), dtype=jnp.float32)
    x = jax.random.normal(k_x, (B, C, H, W), dtype=jnp.float32)

    module = StyleLoss(target)
    out = module(x)

    jax.block_until_ready(out)
    jax.block_until_ready(module.loss)

    # sanity check against pure-JAX reference
    def gram_ref(v):
        b, c, h, w = v.shape
        f = v.reshape(b * c, h * w)
        g = jnp.dot(f, f.T, precision=lax.Precision.HIGHEST)
        return g / (b * c * h * w)

    gram_x_ref = gram_ref(x)
    loss_ref = jnp.mean((gram_x_ref - gram_ref(target)) ** 2)

    assert jnp.allclose(out, x)
    assert jnp.allclose(gram_matrix_pallas(x), gram_x_ref, rtol=1e-4, atol=1e-5)
    assert jnp.allclose(module.loss, loss_ref, rtol=1e-4, atol=1e-6)

    print("KERNEL_OK")
</pallas_src>

<mosaic_0001>
module attributes {stable_mosaic.version = 11 : i64} {
  func.func @_gram_partial_kernel(%arg0: i32, %arg1: i32, %arg2: memref<8x256xf32, #tpu.memory_space<vmem>>, %arg3: memref<1x8x8xf32, #tpu.memory_space<vmem>>) attributes {dimension_semantics = [#tpu.dimension_semantics<parallel>, #tpu.dimension_semantics<arbitrary>], iteration_bounds = array<i64: 1, 1>, scalar_prefetch = 0 : i64, scratch_operands = 0 : i64, tpu.core_type = #tpu.core_type<tc>, window_params = [{transform_indices = @transform_0, window_bounds = array<i64: 8, 256>}, {transform_indices = @transform_1, window_bounds = array<i64: 1, 8, 8>}]} {
    %c0_i32 = arith.constant 0 : i32
    %0 = arith.cmpi eq, %arg1, %c0_i32 : i32
    %1 = arith.extui %0 : i1 to i32
    %c0_i32_0 = arith.constant 0 : i32
    %2 = arith.cmpi ne, %1, %c0_i32_0 : i32
    scf.if %2 {
      %cst_10 = arith.constant 0.000000e+00 : f32
      %20 = vector.broadcast %cst_10 : f32 to vector<8x8xf32>
      %c0_11 = arith.constant 0 : index
      %c0_12 = arith.constant 0 : index
      %c0_13 = arith.constant 0 : index
      %21 = vector.load %arg3[%c0_11, %c0_12, %c0_13] : memref<1x8x8xf32, #tpu.memory_space<vmem>>, vector<1x8x8xf32>
      %22 = vector.shape_cast %21 : vector<1x8x8xf32> to vector<8x8xf32>
      %23 = vector.shape_cast %20 : vector<8x8xf32> to vector<1x8x8xf32>
      tpu.vector_store %arg3[%c0_11, %c0_12, %c0_13], %23 {strides = array<i32>} : memref<1x8x8xf32, #tpu.memory_space<vmem>>, vector<1x8x8xf32>,
    } else {
    }
    %c0 = arith.constant 0 : index
    %c0_1 = arith.constant 0 : index
    %3 = vector.load %arg2[%c0, %c0_1] : memref<8x256xf32, #tpu.memory_space<vmem>>, vector<8x256xf32>
    %c1_i32 = arith.constant 1 : i32
    %4 = arith.muli %arg0, %c1_i32 : i32
    %5 = arith.addi %4, %arg1 : i32
    %c256_i32 = arith.constant 256 : i32
    %6 = arith.muli %5, %c256_i32 : i32
    %c256_i32_2 = arith.constant 256 : i32
    %7 = arith.subi %c256_i32_2, %6 : i32
    %8 = tpu.iota {dimensions = array<i32: 1>} : vector<8x256xi32>
    %9 = vector.broadcast %7 : i32 to vector<8x256xi32>
    %10 = arith.cmpi slt, %8, %9 : vector<8x256xi32>
    %cst = arith.constant 0.000000e+00 : f32
    %11 = vector.broadcast %cst : f32 to vector<8x256xf32>
    %12 = arith.select %10, %3, %11 : vector<8x256xi1>, vector<8x256xf32>
    %c0_3 = arith.constant 0 : index
    %c0_4 = arith.constant 0 : index
    %c0_5 = arith.constant 0 : index
    %13 = vector.load %arg3[%c0_3, %c0_4, %c0_5] : memref<1x8x8xf32, #tpu.memory_space<vmem>>, vector<1x8x8xf32>
    %14 = vector.shape_cast %13 : vector<1x8x8xf32> to vector<8x8xf32>
    %cst_6 = arith.constant dense<0.000000e+00> : vector<8x8xf32>
    %15 = tpu.matmul %12, %12, %cst_6 {dimension_numbers = #tpu.dot_dimension_numbers<[1], [1], [0], [0], [0, 0, 1, 0], [], []>} : vector<8x256xf32>, vector<8x256xf32>, vector<8x8xf32> -> vector<8x8xf32>
    %16 = arith.addf %14, %15 : vector<8x8xf32>
    %c0_7 = arith.constant 0 : index
    %c0_8 = arith.constant 0 : index
    %c0_9 = arith.constant 0 : index
    %17 = vector.load %arg3[%c0_7, %c0_8, %c0_9] : memref<1x8x8xf32, #tpu.memory_space<vmem>>, vector<1x8x8xf32>
    %18 = vector.shape_cast %17 : vector<1x8x8xf32> to vector<8x8xf32>
    %19 = vector.shape_cast %16 : vector<8x8xf32> to vector<1x8x8xf32>
    tpu.vector_store %arg3[%c0_7, %c0_8, %c0_9], %19 {strides = array<i32>} : memref<1x8x8xf32, #tpu.memory_space<vmem>>, vector<1x8x8xf32>,
    return
  }
  func.func @transform_0(%arg0: i32, %arg1: i32) -> (i32, i32) {
    %c1_i32 = arith.constant 1 : i32
    %0 = arith.muli %arg0, %c1_i32 : i32
    %1 = arith.addi %0, %arg1 : i32
    %c0_i32 = arith.constant 0 : i32
    %2 = arith.minsi %1, %c0_i32 : i32
    %c0_i32_0 = arith.constant 0 : i32
    %c0_i32_1 = arith.constant 0 : i32
    return %c0_i32_0, %2 : i32, i32
  }
  func.func @transform_1(%arg0: i32, %arg1: i32) -> (i32, i32, i32) {
    %c0_i32 = arith.constant 0 : i32
    %c0_i32_0 = arith.constant 0 : i32
    %c0_i32_1 = arith.constant 0 : i32
    return %arg0, %c0_i32, %c0_i32_0 : i32, i32, i32
  }
}

</mosaic_0001>

<bundles_post_ra>
// kernel: tpu_custom_call.1
= control target key start
LH: loop header
LB: loop body
LE: loop exit
PB: predicated region body
PF: predicated region fallthrough
CT: control target
= control target key end

     0   :  { %6 = vsyncpa [#allocation3], 0  ;;  %s231_s0 = inlined_call_operand.hbm [shape: f32[8,256], index: 0, kind: input, shape index: {}]   ;;  %s232_s1 = inlined_call_operand.hbm [shape: f32[1,8,8], index: 1, kind: output, shape index: {}]  }
   0x1   :  { %7 = vsyncpa [#allocation4], 0  ;;  %s192_s6 = smov [#allocation2]   ;;  %s144_s10 = scalar_lea.hbm %s231_s0, 256 }
   0x2   :  { %s20_s7 = sshll.u32 %s192_s6, 4  ;;  %p145_p0 = scmp.ne.s32.totalorder %s231_s0, %s144_s10  ;;  %s21_s7 = int_to_ptr.vmem [resolvable:$true] %s20_s7 }
   0x3   :  { %p148_p1 = scmp.lt.u32.totalorder %s144_s10, %s231_s0 }
   0x5   :  { %p150_p2 = pnand %p148_p1, %p145_p0 }
   0x7   :  { %153 = shalt.err (!%p150_p2)
}
   0x8   :  { %s154_s15 = scalar_lea.vmem %s21_s7, 256  ;;  %p159_p4 = scmp.lt.s32.totalorder %s21_s7, %s21_s7 }
   0x9   :  { %p155_p3 = scmp.ne.s32.totalorder %s21_s7, %s154_s15  ;;  %p160_p5 = scmp.lt.s32.totalorder %s154_s15, %s154_s15 }
   0xb   :  { %p161_p6 = por %p160_p5, %p159_p4 }
   0xd   :  { %p162_p7 = pnand %p161_p6, %p155_p3 }
   0xf   :  { %165 = shalt.err (!%p162_p7)
}
  0x10   :  { %23 = dma.hbm_to_vmem [thread:$0]  %s231_s0, 256, %s21_s7, [#allocation3]  }
  0x11   :  { %188 = dma.done.wait [#allocation3], 256  }
  0x12   :  { %189 = vsyncadd [#allocation3], 4294967040  ;;  %vm35_vm0 = vcmask 64512   ;;  %v193_v0 = vmov 0.0   ;;  %v38_v1 = vld [vmem:[#allocation2 + $0x8] sm:$0xff]  ;;  %v37_v2 = vld [vmem:[#allocation2] sm:$0xff] }
  0x13   :  { %36 = vst.msk [vmem:[#allocation5] sm:$0xff] %vm35_vm0, %v193_v0  ;;  %51 = vmatprep.subr.mxu0 %v38_v1  ;;  %115 = vmatprep.mubr.f32.mxu0 %v38_v1  ;;  %s194_s18 = smov [#allocation5]  }
  0x14   :  { %52 = vmatpush1.xpose.msra.mxu0 %v37_v2  ;;  %s130_s19 = sshll.u32 %s194_s18, 4  ;;  %s131_s19 = int_to_ptr.vmem [resolvable:$true] %s130_s19 }
  0x15   :  { %s166_s0 = scalar_lea.vmem %s131_s19, 128  ;;  %p171_p9 = scmp.lt.s32.totalorder %s131_s19, %s131_s19 }
  0x16   :  { %p167_p8 = scmp.ne.s32.totalorder %s131_s19, %s166_s0  ;;  %p172_p10 = scmp.lt.s32.totalorder %s166_s0, %s166_s0 }
  0x17   :  { %116 = vmatmul.mubr.f32.vlgmr.msra.gmra.mrb[0].mxu0 %v37_v2 }
  0x18   :  { %p173_p11 = por %p172_p10, %p171_p9 }
  0x1a   :  { %v50_v3 = vld [vmem:[#allocation5] sm:$0xff]  ;;  %p174_p12 = pnand %p173_p11, %p167_p8 }
  0xea   :  { %v117_v4 = vpop.f32.mrb[0].mxu0 }
  0xeb   :  { %v121_v5 = vadd.f32 %v117_v4, %v50_v3  ;;  %v119_v6 = vpop.f32.mrb[1].mxu0 }
  0xed   :  { %123 = vst.msk [vmem:[#allocation5] sm:$0xff] %vm35_vm0, %v121_v5 }
  0xee   :  { %177 = shalt.err (!%p174_p12)
}
  0xef   :  { %s178_s22 = scalar_lea.hbm %s232_s1, 128 }
  0xf0   :  { %p179_p13 = scmp.ne.s32.totalorder %s232_s1, %s178_s22  ;;  %p182_p0 = scmp.lt.u32.totalorder %s178_s22, %s232_s1 }
  0xf2   :  { %p184_p1 = pnand %p182_p0, %p179_p13 }
  0xf4   :  { %187 = shalt.err (!%p184_p1)
}
  0xf5   :  { %133 = dma.vmem_to_hbm [thread:$0]  %s131_s19, 128, %s232_s1, [#allocation4]  }
  0xf6   :  { %190 = dma.done.wait [#allocation4], 128  }
  0xf7   :  { %191 = vsyncadd [#allocation4], 4294967168 }
  0xf8   :  { %137 = vsyncpa [#allocation3], 1 }
  0xf9   :  { %138 = vsyncpa [#allocation4], 1 }

</bundles_post_ra>
